<compile_context>
chip_gen: v7x
topology: tpu7x:2x2x1
jax: 0.10.0
libtpu: 0.0.40
codegen_flags: <defaults>
</compile_context>

<pallas_src>
import jax
import jax.numpy as jnp
from jax import lax
from jax.experimental import pallas as pl
from jax.experimental.pallas import tpu as pltpu


def _spread_embed_kernel(keys_ref, spread_ref, pos_ref, out_ref):
    # keys_ref:   (tb, T*V) int32  key[b, t*V + v] = tok[b, t] + t*V
    # spread_ref: (T*V, T*D) f32   kron(I_T, emb_table): emb in diagonal block t
    # pos_ref:    (1, T*D)  f32    pos_table[:T] flattened to one lane-dense row
    # out_ref:    (tb, T*D) f32    lane-dense output slab
    tb, TV = keys_ref.shape
    col = lax.broadcasted_iota(jnp.int32, (tb, TV), 1)             # (tb, T*V)
    one_hot = (col == keys_ref[...]).astype(jnp.float32)           # (tb, T*V)

    # Single MXU matmul straight into the output layout: no reshape, no tile.
    gathered = jnp.dot(one_hot, spread_ref[...],
                       preferred_element_type=jnp.float32)         # (tb, T*D)

    # Positional add as a sublane broadcast of one (1, T*D) row.
    out_ref[...] = gathered + pos_ref[...]


def alt_pos_action_tokenized_spread_embedding(tokens, emb_table, pos_table,
                                              *, max_batch_tile=512):
    """tokens: [B, T] int; emb_table: [V, D] f32; pos_table: [max_num_actions, D] f32."""
    B, T = tokens.shape
    V, D = emb_table.shape
    TV, TD = T * V, T * D

    # ---- Host/XLA-side prep (all tiny, done once per call) -----------------
    # Block-diagonal spread table: spread[t*V + v, t*D + d] = emb_table[v, d].
    spread = jnp.kron(jnp.eye(T, dtype=emb_table.dtype), emb_table)   # (TV, TD)
    # One lane-dense positional row: pos_row[0, t*D + d] = pos_table[t, d].
    pos_row = pos_table[:T].reshape(1, TD)
    # Lane-dense per-token keys: key[b, t*V + v] = clip(tok[b, t]) + t*V.
    toks = jnp.clip(tokens.astype(jnp.int32), 0, V - 1)               # (B, T)
    keys = toks + (jnp.arange(T, dtype=jnp.int32) * V)[None, :]       # (B, T)
    keys_spread = jnp.repeat(keys, V, axis=1)                         # (B, TV)

    # ---- Batch tiling: full-sublane tiles, padded batch ---------------------
    tb = min(max_batch_tile, max(8, ((B + 7) // 8) * 8))   # multiple of 8
    Bp = pl.cdiv(B, tb) * tb
    if Bp != B:
        keys_spread = jnp.pad(keys_spread, ((0, Bp - B), (0, 0)))

    out_flat = pl.pallas_call(
        _spread_embed_kernel,
        out_shape=jax.ShapeDtypeStruct((Bp, TD), jnp.float32),
        grid_spec=pltpu.PrefetchScalarGridSpec(
            num_scalar_prefetch=0,
            grid=(Bp // tb,),
            in_specs=[
                pl.BlockSpec((tb, TV), lambda i: (i, 0)),   # batch-tiled keys
                pl.BlockSpec((TV, TD), lambda i: (0, 0)),   # resident spread table
                pl.BlockSpec((1, TD), lambda i: (0, 0)),    # resident pos row
            ],
            out_specs=pl.BlockSpec((tb, TD), lambda i: (i, 0)),
        ),
        compiler_params=pltpu.CompilerParams(
            dimension_semantics=("parallel",),              # megacore on v7x
        ),
    )(keys_spread, spread, pos_row)

    return out_flat[:B].reshape(B, T, D)


if __name__ == "__main__":
    # Module hyperparameters (small, consistent with the forward semantics).
    action_dim = 4
    seq_len = 2
    batch = 2
    embedding_dim = 32       # embedding_dim
    token_size = 32          # vocab size for action_emb
    max_num_actions = 100    # rows in action_pos_emb

    num_tokens = seq_len * action_dim  # tokens fed to forward: [bs, seq_len*action_dim]

    key = jax.random.PRNGKey(0)
    k_emb, k_pos, k_tok = jax.random.split(key, 3)

    # nn.Embedding default init ~ N(0, 1)
    action_emb_weight = jax.random.normal(k_emb, (token_size, embedding_dim), jnp.float32)
    action_pos_emb_weight = jax.random.normal(k_pos, (max_num_actions, embedding_dim), jnp.float32)

    tokens = jax.random.randint(k_tok, (batch, num_tokens), 0, token_size, dtype=jnp.int32)

    out = alt_pos_action_tokenized_spread_embedding(
        tokens, action_emb_weight, action_pos_emb_weight
    )
    out = jax.block_until_ready(out)

    # Pure-JAX reference of the PyTorch forward.
    ref = action_emb_weight[tokens] + action_pos_emb_weight[:num_tokens][None, :, :]
    assert out.shape == (batch, num_tokens, embedding_dim)
    assert jnp.allclose(out, ref, atol=1e-5, rtol=1e-5)

    print("KERNEL_OK")
</pallas_src>

<mosaic_0001>
module attributes {stable_mosaic.version = 11 : i64} {
  func.func @_spread_embed_kernel(%arg0: i32, %arg1: memref<8x256xi32, #tpu.memory_space<vmem>>, %arg2: memref<256x256xf32, #tpu.memory_space<vmem>>, %arg3: memref<1x256xf32, #tpu.memory_space<vmem>>, %arg4: memref<8x256xf32, #tpu.memory_space<vmem>>) attributes {dimension_semantics = [#tpu.dimension_semantics<parallel>], iteration_bounds = array<i64: 1>, scalar_prefetch = 0 : i64, scratch_operands = 0 : i64, tpu.core_type = #tpu.core_type<tc>, window_params = [{transform_indices = @transform_0, window_bounds = array<i64: 8, 256>}, {pipeline_mode = #tpu.pipeline_mode<synchronous>, transform_indices = @transform_1, window_bounds = array<i64: 256, 256>}, {pipeline_mode = #tpu.pipeline_mode<synchronous>, transform_indices = @transform_2, window_bounds = array<i64: 1, 256>}, {transform_indices = @transform_3, window_bounds = array<i64: 8, 256>}]} {
    %0 = tpu.iota {dimensions = array<i32: 1>} : vector<8x256xi32>
    %c0 = arith.constant 0 : index
    %c0_0 = arith.constant 0 : index
    %1 = vector.load %arg1[%c0, %c0_0] : memref<8x256xi32, #tpu.memory_space<vmem>>, vector<8x256xi32>
    %2 = arith.cmpi eq, %0, %1 : vector<8x256xi32>
    %3 = arith.extui %2 : vector<8x256xi1> to vector<8x256xi32>
    %4 = arith.sitofp %3 : vector<8x256xi32> to vector<8x256xf32>
    %c0_1 = arith.constant 0 : index
    %c0_2 = arith.constant 0 : index
    %5 = vector.load %arg2[%c0_1, %c0_2] : memref<256x256xf32, #tpu.memory_space<vmem>>, vector<256x256xf32>
    %cst = arith.constant dense<0.000000e+00> : vector<8x256xf32>
    %6 = tpu.matmul %4, %5, %cst {dimension_numbers = #tpu.dot_dimension_numbers<[1], [0], [0], [1], [0, 0, 1, 1], [], []>} : vector<8x256xf32>, vector<256x256xf32>, vector<8x256xf32> -> vector<8x256xf32>
    %c0_3 = arith.constant 0 : index
    %c0_4 = arith.constant 0 : index
    %7 = vector.load %arg3[%c0_3, %c0_4] : memref<1x256xf32, #tpu.memory_space<vmem>>, vector<1x256xf32>
    %8 = vector.broadcast %7 : vector<1x256xf32> to vector<8x256xf32>
    %9 = arith.addf %6, %8 : vector<8x256xf32>
    %c0_5 = arith.constant 0 : index
    %c0_6 = arith.constant 0 : index
    %10 = vector.load %arg4[%c0_5, %c0_6] : memref<8x256xf32, #tpu.memory_space<vmem>>, vector<8x256xf32>
    tpu.vector_store %arg4[%c0_5, %c0_6], %9 {strides = array<i32>} : memref<8x256xf32, #tpu.memory_space<vmem>>, vector<8x256xf32>,
    return
  }
  func.func @transform_0(%arg0: i32) -> (i32, i32) {
    %c0_i32 = arith.constant 0 : i32
    %c0_i32_0 = arith.constant 0 : i32
    return %arg0, %c0_i32 : i32, i32
  }
  func.func @transform_1(%arg0: i32) -> (i32, i32) {
    %c0_i32 = arith.constant 0 : i32
    %c0_i32_0 = arith.constant 0 : i32
    %c0_i32_1 = arith.constant 0 : i32
    return %c0_i32, %c0_i32_0 : i32, i32
  }
  func.func @transform_2(%arg0: i32) -> (i32, i32) {
    %c0_i32 = arith.constant 0 : i32
    %c0_i32_0 = arith.constant 0 : i32
    %c0_i32_1 = arith.constant 0 : i32
    return %c0_i32, %c0_i32_0 : i32, i32
  }
  func.func @transform_3(%arg0: i32) -> (i32, i32) {
    %c0_i32 = arith.constant 0 : i32
    %c0_i32_0 = arith.constant 0 : i32
    return %arg0, %c0_i32 : i32, i32
  }
}

</mosaic_0001>

<bundles_post_ra>
// kernel: tpu_custom_call.1
= control target key start
LH: loop header
LB: loop body
LE: loop exit
PB: predicated region body
PF: predicated region fallthrough
CT: control target
= control target key end

     0   :  { %8 = vsyncpa [#allocation3], 0  ;;  %s443_s0 = inlined_call_operand.hbm [shape: s32[8,256], index: 0, kind: input, shape index: {}]   ;;  %s444_s1 = inlined_call_operand.hbm [shape: f32[256,256], index: 1, kind: input, shape index: {}]   ;;  %s445_s2 = inlined_call_operand.vmem [shape: f32[1,256], index: 2, kind: input, shape index: {}]   ;;  %s446_s3 = inlined_call_operand.hbm [shape: f32[8,256], index: 3, kind: output, shape index: {}]  }
   0x1   :  { %9 = vsyncpa [#allocation6], 0 }
   0x2   :  { %10 = vsyncpa [#allocation4], 0  ;;  %s363_s12 = smov [#allocation2]   ;;  %s364_s14 = smov [#allocation5]  }
   0x3   :  { %s17_s13 = sshll.u32 %s363_s12, 4  ;;  %s26_s15 = sshll.u32 %s364_s14, 4  ;;  %s18_s13 = int_to_ptr.vmem [resolvable:$true] %s17_s13  ;;  %s389_s15 = int_to_ptr.vmem [resolvable:$true] %s26_s15 }
   0x4   :  { %s291_s18 = scalar_lea.hbm %s443_s0, 256 }
   0x5   :  { %p292_p0 = scmp.ne.s32.totalorder %s443_s0, %s291_s18  ;;  %p295_p1 = scmp.lt.u32.totalorder %s291_s18, %s443_s0 }
   0x7   :  { %p297_p2 = pnand %p295_p1, %p292_p0 }
   0x9   :  { %300 = shalt.err (!%p297_p2)
}
   0xa   :  { %s301_s23 = scalar_lea.vmem %s18_s13, 256  ;;  %p306_p4 = scmp.lt.s32.totalorder %s18_s13, %s18_s13 }
   0xb   :  { %p302_p3 = scmp.ne.s32.totalorder %s18_s13, %s301_s23  ;;  %p307_p5 = scmp.lt.s32.totalorder %s301_s23, %s301_s23 }
   0xd   :  { %p308_p6 = por %p307_p5, %p306_p4 }
   0xf   :  { %p309_p7 = pnand %p308_p6, %p302_p3 }
  0x11   :  { %312 = shalt.err (!%p309_p7)
}
  0x12   :  { %20 = dma.hbm_to_vmem [thread:$0]  %s443_s0, 256, %s18_s13, [#allocation3]  }
  0x13   :  { %s313_s28 = scalar_lea.hbm %s444_s1, 8192 }
  0x14   :  { %p314_p8 = scmp.ne.s32.totalorder %s444_s1, %s313_s28  ;;  %p317_p9 = scmp.lt.u32.totalorder %s313_s28, %s444_s1 }
  0x16   :  { %p319_p10 = pnand %p317_p9, %p314_p8 }
  0x18   :  { %322 = shalt.err (!%p319_p10)
}
  0x19   :  { %s323_s6 = scalar_lea.vmem %s389_s15, 8192  ;;  %p328_p12 = scmp.lt.s32.totalorder %s389_s15, %s389_s15 }
  0x1a   :  { %p324_p11 = scmp.ne.s32.totalorder %s389_s15, %s323_s6  ;;  %p329_p13 = scmp.lt.s32.totalorder %s323_s6, %s323_s6 }
  0x1c   :  { %p330_p0 = por %p329_p13, %p328_p12 }
  0x1e   :  { %p331_p1 = pnand %p330_p0, %p324_p11 }
  0x20   :  { %334 = shalt.err (!%p331_p1)
}
  0x21   :  { %s365_s0 = smov 256   ;;  %s366_s7 = smov 16  }
  0x22   :  { %32 = dma.hbm_to_vmem [thread:$0]  %s444_s1, 8192, %s389_s15, [#allocation6], %s365_s0, %s365_s0, %s366_s7  }
  0x23   :  { %357 = dma.done.wait [#allocation3], 256  }
  0x24   :  { %358 = vsyncadd [#allocation3], 4294967040 }
  0x25   :  { %359 = dma.done.wait [#allocation6], 8192  }
  0x26   :  { %360 = vsyncadd [#allocation6], 4294959104  ;;  %v53_v0 = vld [vmem:[#allocation5 + $0x8] sm:$0xff]  ;;  %v55_v1 = vld [vmem:[#allocation5 + $0x18] sm:$0xff]  ;;  %v41_v25 = vlaneseq  ;;  %v367_v47 = vmov 1.0   ;;  %s368_s11 = smov [#allocation7]  }
  0x27   :  { %v52_v2 = vld [vmem:[#allocation5] sm:$0xff]  ;;  %v221_v3 = vpack.c.bf16 %v55_v1, %v53_v0  ;;  %v54_v4 = vld [vmem:[#allocation5 + $0x10] sm:$0xff]  ;;  %v57_v5 = vld [vmem:[#allocation5 + $0x28] sm:$0xff]  ;;  %s207_s12 = sshll.u32 %s368_s11, 4  ;;  %s208_s12 = int_to_ptr.vmem [resolvable:$true] %s207_s12 }
  0x28   :  { %v59_v6 = vld [vmem:[#allocation5 + $0x38] sm:$0xff]  ;;  %v223_v7 = vpack.c.bf16 %v54_v4, %v52_v2  ;;  %v56_v9 = vld [vmem:[#allocation5 + $0x20] sm:$0xff]  ;;  %v58_v10 = vld [vmem:[#allocation5 + $0x30] sm:$0xff]  ;;  %v421_v32 = vand.u32 127, %v41_v25  ;;  %s335_s13 = scalar_lea.vmem %s208_s12, 256  ;;  %p340_p3 = scmp.lt.s32.totalorder %s208_s12, %s208_s12 }
  0x29   :  { %v225_v8 = vpack.c.bf16 %v59_v6, %v57_v5  ;;  %v61_v11 = vld [vmem:[#allocation5 + $0x48] sm:$0xff]  ;;  %222 = vmatprep.subr.bf16.mxu0 %v221_v3  ;;  %v63_v12 = vld [vmem:[#allocation5 + $0x58] sm:$0xff]  ;;  %v227_v13 = vpack.c.bf16 %v58_v10, %v56_v9  ;;  %v60_v15 = vld [vmem:[#allocation5 + $0x40] sm:$0xff]  ;;  %p336_p2 = scmp.ne.s32.totalorder %s208_s12, %s335_s13  ;;  %p341_p4 = scmp.lt.s32.totalorder %s335_s13, %s335_s13 }
  0x2a   :  { %224 = vmatpush1.bf16.msra.mxu0 %v223_v7  ;;  %v229_v14 = vpack.c.bf16 %v63_v12, %v61_v11  ;;  %v62_v16 = vld [vmem:[#allocation5 + $0x50] sm:$0xff]  ;;  %v65_v17 = vld [vmem:[#allocation5 + $0x68] sm:$0xff]  ;;  %v67_v18 = vld [vmem:[#allocation5 + $0x78] sm:$0xff]  ;;  %v43_v39 = vadd.s32 128, %v421_v32 }
  0x2b   :  { %226 = vmatprep.subr.bf16.mxu0 %v225_v8  ;;  %v231_v19 = vpack.c.bf16 %v62_v16, %v60_v15  ;;  %v233_v20 = vpack.c.bf16 %v67_v18, %v65_v17  ;;  %v64_v21 = vld [vmem:[#allocation5 + $0x60] sm:$0xff]  ;;  %v66_v22 = vld [vmem:[#allocation5 + $0x70] sm:$0xff]  ;;  %v69_v23 = vld [vmem:[#allocation5 + $0x88] sm:$0xff]  ;;  %p342_p5 = por %p341_p4, %p340_p3 }
  0x2c   :  { %v71_v24 = vld [vmem:[#allocation5 + $0x98] sm:$0xff]  ;;  %v235_v26 = vpack.c.bf16 %v66_v22, %v64_v21  ;;  %v68_v28 = vld [vmem:[#allocation5 + $0x80] sm:$0xff]  ;;  %v70_v29 = vld [vmem:[#allocation5 + $0x90] sm:$0xff] }
  0x2d   :  { %v237_v27 = vpack.c.bf16 %v71_v24, %v69_v23  ;;  %v73_v30 = vld [vmem:[#allocation5 + $0xa8] sm:$0xff]  ;;  %v75_v31 = vld [vmem:[#allocation5 + $0xb8] sm:$0xff]  ;;  %v239_v33 = vpack.c.bf16 %v70_v29, %v68_v28  ;;  %v72_v35 = vld [vmem:[#allocation5 + $0xa0] sm:$0xff]  ;;  %p343_p6 = pnand %p342_p5, %p336_p2 }
  0x2e   :  { %228 = vmatpush1.bf16.msra.mxu0 %v227_v13  ;;  %v241_v34 = vpack.c.bf16 %v75_v31, %v73_v30  ;;  %v74_v36 = vld [vmem:[#allocation5 + $0xb0] sm:$0xff]  ;;  %v77_v37 = vld [vmem:[#allocation5 + $0xc8] sm:$0xff]  ;;  %v79_v38 = vld [vmem:[#allocation5 + $0xd8] sm:$0xff] }
  0x2f   :  { %230 = vmatprep.subr.bf16.mxu0 %v229_v14  ;;  %v243_v40 = vpack.c.bf16 %v74_v36, %v72_v35  ;;  %v245_v41 = vpack.c.bf16 %v79_v38, %v77_v37  ;;  %v76_v42 = vld [vmem:[#allocation5 + $0xc0] sm:$0xff]  ;;  %v78_v43 = vld [vmem:[#allocation5 + $0xd0] sm:$0xff]  ;;  %v45_v44 = vld [vmem:[#allocation2 + $0x8] sm:$0xff] }
  0x30   :  { %v81_v45 = vld [vmem:[#allocation5 + $0xe8] sm:$0xff]  ;;  %v83_v46 = vld [vmem:[#allocation5 + $0xf8] sm:$0xff]  ;;  %vm47_vm0 = vcmp.eq.s32.totalorder %v43_v39, %v45_v44  ;;  %v247_v48 = vpack.c.bf16 %v78_v43, %v76_v42  ;;  %v80_v50 = vld [vmem:[#allocation5 + $0xe0] sm:$0xff] }
  0x31   :  { %219 = vmatprep.mubr.msk.f32.mxu0 %vm47_vm0, %v367_v47  ;;  %v249_v49 = vpack.c.bf16 %v83_v46, %v81_v45  ;;  %v82_v51 = vld [vmem:[#allocation5 + $0xf0] sm:$0xff]  ;;  %v85_v52 = vld [vmem:[#allocation5 + $0x108] sm:$0xff]  ;;  %v87_v53 = vld [vmem:[#allocation5 + $0x118] sm:$0xff] }
  0x32   :  { %232 = vmatpush1.bf16.msra.mxu0 %v231_v19  ;;  %v251_v54 = vpack.c.bf16 %v82_v51, %v80_v50  ;;  %v253_v55 = vpack.c.bf16 %v87_v53, %v85_v52  ;;  %v84_v56 = vld [vmem:[#allocation5 + $0x100] sm:$0xff]  ;;  %v86_v57 = vld [vmem:[#allocation5 + $0x110] sm:$0xff]  ;;  %v89_v58 = vld [vmem:[#allocation5 + $0x128] sm:$0xff] }
  0x33   :  { %234 = vmatprep.subr.bf16.mxu0 %v233_v20  ;;  %v91_v59 = vld [vmem:[#allocation5 + $0x138] sm:$0xff]  ;;  %v255_v60 = vpack.c.bf16 %v86_v57, %v84_v56  ;;  %v88_v62 = vld [vmem:[#allocation5 + $0x120] sm:$0xff]  ;;  %v90_v63 = vld [vmem:[#allocation5 + $0x130] sm:$0xff] }
  0x34   :  { %v257_v61 = vpack.c.bf16 %v91_v59, %v89_v58  ;;  %v93_v0 = vld [vmem:[#allocation5 + $0x148] sm:$0xff]  ;;  %v95_v1 = vld [vmem:[#allocation5 + $0x158] sm:$0xff]  ;;  %v259_v2 = vpack.c.bf16 %v90_v63, %v88_v62  ;;  %v92_v4 = vld [vmem:[#allocation5 + $0x140] sm:$0xff] }
  0x35   :  { %v261_v3 = vpack.c.bf16 %v95_v1, %v93_v0  ;;  %v94_v5 = vld [vmem:[#allocation5 + $0x150] sm:$0xff]  ;;  %v97_v6 = vld [vmem:[#allocation5 + $0x168] sm:$0xff]  ;;  %v99_v7 = vld [vmem:[#allocation5 + $0x178] sm:$0xff] }
  0x36   :  { %236 = vmatpush1.bf16.msra.mxu0 %v235_v26  ;;  %v263_v8 = vpack.c.bf16 %v94_v5, %v92_v4  ;;  %v265_v9 = vpack.c.bf16 %v99_v7, %v97_v6  ;;  %v96_v10 = vld [vmem:[#allocation5 + $0x160] sm:$0xff]  ;;  %v98_v11 = vld [vmem:[#allocation5 + $0x170] sm:$0xff]  ;;  %v101_v12 = vld [vmem:[#allocation5 + $0x188] sm:$0xff] }
  0x37   :  { %238 = vmatprep.subr.bf16.mxu0 %v237_v27  ;;  %v103_v13 = vld [vmem:[#allocation5 + $0x198] sm:$0xff]  ;;  %v267_v14 = vpack.c.bf16 %v98_v11, %v96_v10  ;;  %v100_v16 = vld [vmem:[#allocation5 + $0x180] sm:$0xff]  ;;  %v102_v17 = vld [vmem:[#allocation5 + $0x190] sm:$0xff] }
  0x38   :  { %v269_v15 = vpack.c.bf16 %v103_v13, %v101_v12  ;;  %v105_v18 = vld [vmem:[#allocation5 + $0x1a8] sm:$0xff]  ;;  %v107_v19 = vld [vmem:[#allocation5 + $0x1b8] sm:$0xff]  ;;  %v271_v20 = vpack.c.bf16 %v102_v17, %v100_v16  ;;  %v104_v22 = vld [vmem:[#allocation5 + $0x1a0] sm:$0xff] }
  0x39   :  { %v273_v21 = vpack.c.bf16 %v107_v19, %v105_v18  ;;  %v106_v23 = vld [vmem:[#allocation5 + $0x1b0] sm:$0xff]  ;;  %v109_v24 = vld [vmem:[#allocation5 + $0x1c8] sm:$0xff]  ;;  %v111_v26 = vld [vmem:[#allocation5 + $0x1d8] sm:$0xff] }
  0x3a   :  { %240 = vmatpush1.bf16.msra.mxu0 %v239_v33  ;;  %v275_v27 = vpack.c.bf16 %v106_v23, %v104_v22  ;;  %v277_v28 = vpack.c.bf16 %v111_v26, %v109_v24  ;;  %v108_v29 = vld [vmem:[#allocation5 + $0x1c0] sm:$0xff]  ;;  %v110_v30 = vld [vmem:[#allocation5 + $0x1d0] sm:$0xff]  ;;  %v113_v31 = vld [vmem:[#allocation5 + $0x1e8] sm:$0xff] }
  0x3b   :  { %242 = vmatprep.subr.bf16.mxu0 %v241_v34  ;;  %v115_v33 = vld [vmem:[#allocation5 + $0x1f8] sm:$0xff]  ;;  %v279_v34 = vpack.c.bf16 %v110_v30, %v108_v29  ;;  %v112_v36 = vld [vmem:[#allocation5 + $0x1e0] sm:$0xff]  ;;  %v114_v37 = vld [vmem:[#allocation5 + $0x1f0] sm:$0xff] }
  0x3c   :  { %v281_v35 = vpack.c.bf16 %v115_v33, %v113_v31  ;;  %v283_v38 = vpack.c.bf16 %v114_v37, %v112_v36  ;;  %v44_v39 = vld [vmem:[#allocation2] sm:$0xff] }
  0x3d   :  { %vm46_vm1 = vcmp.eq.s32.totalorder %v421_v32, %v44_v39  ;;  %v116_v42 = vld [vmem:[%s445_s2] sm:$0x3] }
  0x3e   :  { %244 = vmatpush1.bf16.msra.mxu0 %v243_v40  ;;  %v119_v40 = vshrl.u32 %v41_v25, 7 }
  0x3f   :  { %246 = vmatprep.subr.bf16.mxu0 %v245_v41 }
  0x40   :  { %v120_v41 = vsub.s32 0, %v119_v40  ;;  %v124_v43 = vsub.s32 1, %v119_v40 }
  0x42   :  { %248 = vmatpush1.bf16.msra.mxu0 %v247_v48  ;;  %v121_v44 = vrot.slane %v116_v42, %v120_v41  ;;  %v125_v45 = vrot.slane %v116_v42, %v124_v43 }
  0x43   :  { %250 = vmatprep.subr.bf16.mxu0 %v249_v49 }
  0x46   :  { %252 = vmatpush1.bf16.msra.mxu0 %v251_v54 }
  0x47   :  { %254 = vmatprep.subr.bf16.mxu0 %v253_v55 }
  0x4a   :  { %256 = vmatpush1.bf16.msra.mxu0 %v255_v60 }
  0x4b   :  { %258 = vmatprep.subr.bf16.mxu0 %v257_v61 }
  0x4e   :  { %260 = vmatpush1.bf16.msra.mxu0 %v259_v2 }
  0x4f   :  { %262 = vmatprep.subr.bf16.mxu0 %v261_v3 }
  0x52   :  { %264 = vmatpush1.bf16.msra.mxu0 %v263_v8 }
  0x53   :  { %266 = vmatprep.subr.bf16.mxu0 %v265_v9 }
  0x56   :  { %268 = vmatpush1.bf16.msra.mxu0 %v267_v14 }
  0x57   :  { %270 = vmatprep.subr.bf16.mxu0 %v269_v15 }
  0x5a   :  { %272 = vmatpush1.bf16.msra.mxu0 %v271_v20 }
  0x5b   :  { %274 = vmatprep.subr.bf16.mxu0 %v273_v21 }
  0x5e   :  { %276 = vmatpush1.bf16.msra.mxu0 %v275_v27 }
  0x5f   :  { %278 = vmatprep.subr.bf16.mxu0 %v277_v28 }
  0x62   :  { %280 = vmatpush1.bf16.msra.mxu0 %v279_v34 }
  0x63   :  { %282 = vmatprep.subr.bf16.mxu0 %v281_v35 }
  0x66   :  { %284 = vmatpush1.bf16.msra.mxu0 %v283_v38 }
  0x69   :  { %220 = vmatmul.mubr.msk.f32.vlgmr.msra.gmra.mrb[0].mxu0 %vm46_vm1, %v367_v47 }
 0x13c   :  { %v194_v46 = vpop.f32.mrb[0].mxu0 }
 0x13d   :  { %v195_v48 = vadd.f32 %v194_v46, %v121_v44  ;;  %v196_v49 = vpop.f32.mrb[1].mxu0 }
 0x13e   :  { %v197_v50 = vadd.f32 %v196_v49, %v125_v45 }
 0x13f   :  { %199 = vst [vmem:[#allocation7] sm:$0xff] %v195_v48 }
 0x140   :  { %200 = vst [vmem:[#allocation7 + $0x8] sm:$0xff] %v197_v50 }
 0x141   :  { %346 = shalt.err (!%p343_p6)
}
 0x142   :  { %s347_s15 = scalar_lea.hbm %s446_s3, 256 }
 0x143   :  { %p348_p7 = scmp.ne.s32.totalorder %s446_s3, %s347_s15  ;;  %p351_p8 = scmp.lt.u32.totalorder %s347_s15, %s446_s3 }
 0x145   :  { %p353_p9 = pnand %p351_p8, %p348_p7 }
 0x147   :  { %356 = shalt.err (!%p353_p9)
}
 0x148   :  { %210 = dma.vmem_to_hbm [thread:$0]  %s208_s12, 256, %s446_s3, [#allocation4]  }
 0x149   :  { %361 = dma.done.wait [#allocation4], 256  }
 0x14a   :  { %362 = vsyncadd [#allocation4], 4294967040 }
 0x14b   :  { %214 = vsyncpa [#allocation3], 1 }
 0x14c   :  { %215 = vsyncpa [#allocation6], 1 }
 0x14d   :  { %216 = vsyncpa [#allocation4], 1 }

</bundles_post_ra>
